<compile_context>
chip_gen: v7x
topology: tpu7x:2x2x1
jax: 0.10.0
libtpu: 0.0.40
codegen_flags: <defaults>
</compile_context>

<pallas_src>
import jax
import jax.numpy as jnp
from jax.experimental import pallas as pl
from jax.experimental.pallas import tpu as pltpu

# ----------------------------- configuration -----------------------------
OBS_DIM = 16
CONTEXT_DIM = (4, 8)                      # context (B, 4, 8) -> flattened to 32
CTX_FLAT = CONTEXT_DIM[0] * CONTEXT_DIM[1]
HIDDEN_DIMS = [32, 32]
H1, H2 = HIDDEN_DIMS
LATENT_DIM = 8
PARAMS_PER_LATENT = 2
LEAKY_SLOPE = 0.01                        # nn.LeakyReLU default negative_slope
VAR_EPS = 1e-6
IN_DIM = OBS_DIM + CTX_FLAT
OUT_DIM = LATENT_DIM * PARAMS_PER_LATENT


# ------------------------------- kernel ----------------------------------
def encoder_kernel(obs_ref, ctx_ref,
                   w1o_ref, w1c_ref, b1_ref,
                   w2_ref, b2_ref,
                   w3_ref, b3_ref,
                   out_ref):
    """Fused MLP + Normal parameterization, feature-major (batch in lanes).

    obs: (tb, OBS_DIM), ctx: (tb, CTX_FLAT)  ->  transposed in-kernel.
    weights arrive pre-transposed: w* is (out_features, in_features).
    layer1: W1o@obs^T + W1c@ctx^T + b1, LeakyReLU      (split == concat)
    layer2: (H2, H1) @ h + b2, LeakyReLU
    layer3: (OUT_DIM, H2) @ h + b3, no activation       -> p: (OUT_DIM, tb)
    out sublanes [0, L)  = mean
    out sublanes [L, 2L) = sqrt(exp(logvar) + 1e-6)
    """
    # XLU transposes (free slot: MXU/VPU are nearly idle for this kernel).
    obs_t = obs_ref[...].T          # (OBS_DIM, tb)
    ctx_t = ctx_ref[...].T          # (CTX_FLAT, tb)

    # --- layer 1 (two tiny MXU pushes instead of any concat) ---
    h = (jnp.dot(w1o_ref[...], obs_t, preferred_element_type=jnp.float32)
         + jnp.dot(w1c_ref[...], ctx_t, preferred_element_type=jnp.float32)
         + b1_ref[...])                                   # (H1, tb) f32
    h = jnp.where(h > 0, h, LEAKY_SLOPE * h)

    # --- layer 2 ---
    h = jnp.dot(w2_ref[...], h, preferred_element_type=jnp.float32) + b2_ref[...]
    h = jnp.where(h > 0, h, LEAKY_SLOPE * h)              # (H2, tb)

    # --- output layer (no activation) ---
    p = jnp.dot(w3_ref[...], h, preferred_element_type=jnp.float32) + b3_ref[...]

    # --- epilogue: sublane-aligned halves, lane-dense stores ---
    out_ref[:LATENT_DIM, :] = p[:LATENT_DIM, :].astype(out_ref.dtype)
    out_ref[LATENT_DIM:, :] = jnp.sqrt(
        jnp.exp(p[LATENT_DIM:, :]) + VAR_EPS).astype(out_ref.dtype)


# ------------------------------- wrapper ----------------------------------
def _round_up(x, m):
    return ((x + m - 1) // m) * m


def _choose_batch_tile(B, batch_tile):
    """Batch tile: multiple of 128 (lane-dense output) or full extent."""
    batch_tile = max(128, _round_up(int(batch_tile), 128))
    if B < 256:
        return B                                   # single full-extent block
    if B <= batch_tile:
        # >= 2 parallel grid steps so both v7x TensorCores share the batch.
        return min(batch_tile, _round_up(pl.cdiv(B, 2), 128))
    return batch_tile


def encoder_forward(obs, context, params, *, batch_tile=4096):
    """Returns (mean, std) of the Normal distribution produced by Encoder."""
    B = obs.shape[0]
    ctx = context.reshape(B, CTX_FLAT)             # contiguous flatten, no copy
    cdt = obs.dtype                                # bf16 inputs accepted as-is

    (w1, b1), (w2, b2), (w3, b3) = params
    # Pre-transpose (tiny) weights to (out, in); split layer-1 weight.
    w1o_t = w1[:OBS_DIM].T.astype(cdt)             # (H1, OBS_DIM)
    w1c_t = w1[OBS_DIM:].T.astype(cdt)             # (H1, CTX_FLAT)
    w2_t = w2.T.astype(cdt)                        # (H2, H1)
    w3_t = w3.T.astype(cdt)                        # (OUT_DIM, H2)
    b1c = b1.reshape(H1, 1).astype(jnp.float32)
    b2c = b2.reshape(H2, 1).astype(jnp.float32)
    b3c = b3.reshape(OUT_DIM, 1).astype(jnp.float32)

    tb = _choose_batch_tile(B, batch_tile)
    grid = (pl.cdiv(B, tb),)        # no wrapper pad; Pallas clips last block

    itemsize = jnp.dtype(cdt).itemsize
    mm_terms = IN_DIM * H1 + H1 * H2 + H2 * OUT_DIM
    cost = pl.CostEstimate(
        flops=2 * B * mm_terms,
        transcendentals=2 * B * LATENT_DIM,
        bytes_accessed=(B * (OBS_DIM + CTX_FLAT) * itemsize
                        + B * OUT_DIM * 4
                        + mm_terms * itemsize + (H1 + H2 + OUT_DIM) * 4),
    )

    out = pl.pallas_call(
        encoder_kernel,
        out_shape=jax.ShapeDtypeStruct((OUT_DIM, B), jnp.float32),
        grid=grid,
        in_specs=[
            pl.BlockSpec((tb, OBS_DIM), lambda i: (i, 0)),      # batch-tiled
            pl.BlockSpec((tb, CTX_FLAT), lambda i: (i, 0)),     # batch-tiled
            pl.BlockSpec((H1, OBS_DIM), lambda i: (0, 0)),      # resident
            pl.BlockSpec((H1, CTX_FLAT), lambda i: (0, 0)),
            pl.BlockSpec((H1, 1), lambda i: (0, 0)),
            pl.BlockSpec((H2, H1), lambda i: (0, 0)),
            pl.BlockSpec((H2, 1), lambda i: (0, 0)),
            pl.BlockSpec((OUT_DIM, H2), lambda i: (0, 0)),
            pl.BlockSpec((OUT_DIM, 1), lambda i: (0, 0)),
        ],
        out_specs=pl.BlockSpec((OUT_DIM, tb), lambda i: (0, i)),  # lane-dense
        compiler_params=pltpu.CompilerParams(
            dimension_semantics=("parallel",),     # batch split across TCs
            vmem_limit_bytes=32 * 1024 * 1024),    # safe on v5e/v6e/v7x
        cost_estimate=cost,
    )(obs, ctx, w1o_t, w1c_t, b1c, w2_t, b2c, w3_t, b3c)

    # Tiny (16, B) un-transpose in the wrapper; consumers that accept
    # feature-major output can take `out` directly.
    mean = out[:LATENT_DIM, :].T
    std = out[LATENT_DIM:, :].T
    return mean, std


# -------------------------- pure-JAX reference -----------------------------
def encoder_reference(obs, context, params):
    hp = jax.lax.Precision.HIGHEST
    x = jnp.concatenate(
        [obs.astype(jnp.float32),
         context.reshape(obs.shape[0], -1).astype(jnp.float32)], axis=-1)
    (w1, b1), (w2, b2), (w3, b3) = params
    h = jnp.dot(x, w1, precision=hp) + b1
    h = jnp.where(h > 0, h, LEAKY_SLOPE * h)
    h = jnp.dot(h, w2, precision=hp) + b2
    h = jnp.where(h > 0, h, LEAKY_SLOPE * h)
    p = jnp.dot(h, w3, precision=hp) + b3
    mean, logvar = p[:, :LATENT_DIM], p[:, LATENT_DIM:]
    return mean, jnp.sqrt(jnp.exp(logvar) + VAR_EPS)


# -------------------------- deterministic init -----------------------------
def init_params(key):
    """Linear-layer params stored as (in, out) matrices (transpose of torch)."""
    dims = [IN_DIM] + HIDDEN_DIMS + [OUT_DIM]
    params = []
    for d_in, d_out in zip(dims[:-1], dims[1:]):
        key, kw, kb = jax.random.split(key, 3)
        bound = 1.0 / jnp.sqrt(d_in)  # matches nn.Linear uniform init range
        w = jax.random.uniform(kw, (d_in, d_out), jnp.float32, -bound, bound)
        b = jax.random.uniform(kb, (d_out,), jnp.float32, -bound, bound)
        params.append((w, b))
    return params


# --------------------------------- main ------------------------------------
if __name__ == "__main__":
    key = jax.random.PRNGKey(0)
    k_par, k1, k2, k3, k4 = jax.random.split(key, 5)
    params = init_params(k_par)

    # --- tiny-batch path: single full-extent block, grid=(1,) ---
    B = 4
    obs = jax.random.normal(k1, (B, OBS_DIM), jnp.float32)
    context = jax.random.normal(k2, (B,) + CONTEXT_DIM, jnp.float32)
    mean, std = encoder_forward(obs, context, params)
    jax.block_until_ready((mean, std))

    ref_mean, ref_std = encoder_reference(obs, context, params)
    assert mean.shape == (B, LATENT_DIM) and std.shape == (B, LATENT_DIM)
    assert bool(jnp.all(std > 0))
    assert bool(jnp.allclose(mean, ref_mean, rtol=1e-3, atol=1e-3))
    assert bool(jnp.allclose(std, ref_std, rtol=1e-3, atol=1e-3))

    # --- mid-batch path: tb=256 (>=2 parallel steps), partial last block ---
    B2 = 300
    obs2 = jax.random.normal(k3, (B2, OBS_DIM), jnp.float32)
    context2 = jax.random.normal(k4, (B2,) + CONTEXT_DIM, jnp.float32)
    mean2, std2 = encoder_forward(obs2, context2, params)
    jax.block_until_ready((mean2, std2))

    ref_mean2, ref_std2 = encoder_reference(obs2, context2, params)
    assert mean2.shape == (B2, LATENT_DIM) and std2.shape == (B2, LATENT_DIM)
    assert bool(jnp.all(std2 > 0))
    assert bool(jnp.allclose(mean2, ref_mean2, rtol=1e-3, atol=1e-3))
    assert bool(jnp.allclose(std2, ref_std2, rtol=1e-3, atol=1e-3))

    # --- explicit-tile path: batch_tile=128 -> grid=(3,), partial last ---
    mean3, std3 = encoder_forward(obs2, context2, params, batch_tile=128)
    jax.block_until_ready((mean3, std3))
    assert bool(jnp.allclose(mean3, ref_mean2, rtol=1e-3, atol=1e-3))
    assert bool(jnp.allclose(std3, ref_std2, rtol=1e-3, atol=1e-3))

    print("KERNEL_OK")
</pallas_src>

<mosaic_0001>
module attributes {stable_mosaic.version = 11 : i64} {
  func.func @encoder_kernel(%arg0: i32, %arg1: memref<4x16xf32, #tpu.memory_space<vmem>>, %arg2: memref<4x32xf32, #tpu.memory_space<vmem>>, %arg3: memref<32x16xf32, #tpu.memory_space<vmem>>, %arg4: memref<32x32xf32, #tpu.memory_space<vmem>>, %arg5: memref<32x1xf32, #tpu.memory_space<vmem>>, %arg6: memref<32x32xf32, #tpu.memory_space<vmem>>, %arg7: memref<32x1xf32, #tpu.memory_space<vmem>>, %arg8: memref<16x32xf32, #tpu.memory_space<vmem>>, %arg9: memref<16x1xf32, #tpu.memory_space<vmem>>, %arg10: memref<16x4xf32, #tpu.memory_space<vmem>>) attributes {dimension_semantics = [#tpu.dimension_semantics<parallel>], iteration_bounds = array<i64: 1>, scalar_prefetch = 0 : i64, scratch_operands = 0 : i64, tpu.core_type = #tpu.core_type<tc>, window_params = [{transform_indices = @transform_0, window_bounds = array<i64: 4, 16>}, {transform_indices = @transform_1, window_bounds = array<i64: 4, 32>}, {pipeline_mode = #tpu.pipeline_mode<synchronous>, transform_indices = @transform_2, window_bounds = array<i64: 32, 16>}, {pipeline_mode = #tpu.pipeline_mode<synchronous>, transform_indices = @transform_3, window_bounds = array<i64: 32, 32>}, {pipeline_mode = #tpu.pipeline_mode<synchronous>, transform_indices = @transform_4, window_bounds = array<i64: 32, 1>}, {pipeline_mode = #tpu.pipeline_mode<synchronous>, transform_indices = @transform_5, window_bounds = array<i64: 32, 32>}, {pipeline_mode = #tpu.pipeline_mode<synchronous>, transform_indices = @transform_6, window_bounds = array<i64: 32, 1>}, {pipeline_mode = #tpu.pipeline_mode<synchronous>, transform_indices = @transform_7, window_bounds = array<i64: 16, 32>}, {pipeline_mode = #tpu.pipeline_mode<synchronous>, transform_indices = @transform_8, window_bounds = array<i64: 16, 1>}, {transform_indices = @transform_9, window_bounds = array<i64: 16, 4>}]} {
    %c0 = arith.constant 0 : index
    %c0_0 = arith.constant 0 : index
    %0 = vector.load %arg1[%c0, %c0_0] : memref<4x16xf32, #tpu.memory_space<vmem>>, vector<4x16xf32>
    %1 = tpu.transpose %0, [1, 0] : vector<4x16xf32> -> vector<16x4xf32>
    %c0_1 = arith.constant 0 : index
    %c0_2 = arith.constant 0 : index
    %2 = vector.load %arg2[%c0_1, %c0_2] : memref<4x32xf32, #tpu.memory_space<vmem>>, vector<4x32xf32>
    %3 = tpu.transpose %2, [1, 0] : vector<4x32xf32> -> vector<32x4xf32>
    %c0_3 = arith.constant 0 : index
    %c0_4 = arith.constant 0 : index
    %4 = vector.load %arg3[%c0_3, %c0_4] : memref<32x16xf32, #tpu.memory_space<vmem>>, vector<32x16xf32>
    %cst = arith.constant dense<0.000000e+00> : vector<32x4xf32>
    %5 = tpu.matmul %4, %1, %cst {dimension_numbers = #tpu.dot_dimension_numbers<[1], [0], [0], [1], [0, 0, 1, 1], [], []>} : vector<32x16xf32>, vector<16x4xf32>, vector<32x4xf32> -> vector<32x4xf32>
    %c0_5 = arith.constant 0 : index
    %c0_6 = arith.constant 0 : index
    %6 = vector.load %arg4[%c0_5, %c0_6] : memref<32x32xf32, #tpu.memory_space<vmem>>, vector<32x32xf32>
    %cst_7 = arith.constant dense<0.000000e+00> : vector<32x4xf32>
    %7 = tpu.matmul %6, %3, %cst_7 {dimension_numbers = #tpu.dot_dimension_numbers<[1], [0], [0], [1], [0, 0, 1, 1], [], []>} : vector<32x32xf32>, vector<32x4xf32>, vector<32x4xf32> -> vector<32x4xf32>
    %8 = arith.addf %5, %7 : vector<32x4xf32>
    %c0_8 = arith.constant 0 : index
    %c0_9 = arith.constant 0 : index
    %9 = vector.load %arg5[%c0_8, %c0_9] : memref<32x1xf32, #tpu.memory_space<vmem>>, vector<32x1xf32>
    %10 = vector.broadcast %9 : vector<32x1xf32> to vector<32x4xf32>
    %11 = arith.addf %8, %10 : vector<32x4xf32>
    %cst_10 = arith.constant 0.000000e+00 : f32
    %12 = vector.broadcast %cst_10 : f32 to vector<32x4xf32>
    %13 = arith.cmpf ogt, %11, %12 : vector<32x4xf32>
    %cst_11 = arith.constant 0.00999999977 : f32
    %14 = vector.broadcast %cst_11 : f32 to vector<32x4xf32>
    %15 = arith.mulf %14, %11 : vector<32x4xf32>
    %16 = arith.select %13, %11, %15 : vector<32x4xi1>, vector<32x4xf32>
    %c0_12 = arith.constant 0 : index
    %c0_13 = arith.constant 0 : index
    %17 = vector.load %arg6[%c0_12, %c0_13] : memref<32x32xf32, #tpu.memory_space<vmem>>, vector<32x32xf32>
    %cst_14 = arith.constant dense<0.000000e+00> : vector<32x4xf32>
    %18 = tpu.matmul %17, %16, %cst_14 {dimension_numbers = #tpu.dot_dimension_numbers<[1], [0], [0], [1], [0, 0, 1, 1], [], []>} : vector<32x32xf32>, vector<32x4xf32>, vector<32x4xf32> -> vector<32x4xf32>
    %c0_15 = arith.constant 0 : index
    %c0_16 = arith.constant 0 : index
    %19 = vector.load %arg7[%c0_15, %c0_16] : memref<32x1xf32, #tpu.memory_space<vmem>>, vector<32x1xf32>
    %20 = vector.broadcast %19 : vector<32x1xf32> to vector<32x4xf32>
    %21 = arith.addf %18, %20 : vector<32x4xf32>
    %cst_17 = arith.constant 0.000000e+00 : f32
    %22 = vector.broadcast %cst_17 : f32 to vector<32x4xf32>
    %23 = arith.cmpf ogt, %21, %22 : vector<32x4xf32>
    %cst_18 = arith.constant 0.00999999977 : f32
    %24 = vector.broadcast %cst_18 : f32 to vector<32x4xf32>
    %25 = arith.mulf %24, %21 : vector<32x4xf32>
    %26 = arith.select %23, %21, %25 : vector<32x4xi1>, vector<32x4xf32>
    %c0_19 = arith.constant 0 : index
    %c0_20 = arith.constant 0 : index
    %27 = vector.load %arg8[%c0_19, %c0_20] : memref<16x32xf32, #tpu.memory_space<vmem>>, vector<16x32xf32>
    %cst_21 = arith.constant dense<0.000000e+00> : vector<16x4xf32>
    %28 = tpu.matmul %27, %26, %cst_21 {dimension_numbers = #tpu.dot_dimension_numbers<[1], [0], [0], [1], [0, 0, 1, 1], [], []>} : vector<16x32xf32>, vector<32x4xf32>, vector<16x4xf32> -> vector<16x4xf32>
    %c0_22 = arith.constant 0 : index
    %c0_23 = arith.constant 0 : index
    %29 = vector.load %arg9[%c0_22, %c0_23] : memref<16x1xf32, #tpu.memory_space<vmem>>, vector<16x1xf32>
    %30 = vector.broadcast %29 : vector<16x1xf32> to vector<16x4xf32>
    %31 = arith.addf %28, %30 : vector<16x4xf32>
    %32 = vector.extract_strided_slice %31 {offsets = [0, 0], sizes = [8, 4], strides = [1, 1]} : vector<16x4xf32> to vector<8x4xf32>
    %c0_24 = arith.constant 0 : index
    %c0_25 = arith.constant 0 : index
    %33 = vector.load %arg10[%c0_24, %c0_25] : memref<16x4xf32, #tpu.memory_space<vmem>>, vector<8x4xf32>
    tpu.vector_store %arg10[%c0_24, %c0_25], %32 {strides = array<i32>} : memref<16x4xf32, #tpu.memory_space<vmem>>, vector<8x4xf32>,
    %34 = vector.extract_strided_slice %31 {offsets = [8, 0], sizes = [8, 4], strides = [1, 1]} : vector<16x4xf32> to vector<8x4xf32>
    %35 = math.exp %34 : vector<8x4xf32>
    %cst_26 = arith.constant 9.99999997E-7 : f32
    %36 = vector.broadcast %cst_26 : f32 to vector<8x4xf32>
    %37 = arith.addf %35, %36 : vector<8x4xf32>
    %38 = math.sqrt %37 : vector<8x4xf32>
    %c8 = arith.constant 8 : index
    %c0_27 = arith.constant 0 : index
    %39 = vector.load %arg10[%c8, %c0_27] : memref<16x4xf32, #tpu.memory_space<vmem>>, vector<8x4xf32>
    tpu.vector_store %arg10[%c8, %c0_27], %38 {strides = array<i32>} : memref<16x4xf32, #tpu.memory_space<vmem>>, vector<8x4xf32>,
    return
  }
  func.func @transform_0(%arg0: i32) -> (i32, i32) {
    %c0_i32 = arith.constant 0 : i32
    %c0_i32_0 = arith.constant 0 : i32
    return %arg0, %c0_i32 : i32, i32
  }
  func.func @transform_1(%arg0: i32) -> (i32, i32) {
    %c0_i32 = arith.constant 0 : i32
    %c0_i32_0 = arith.constant 0 : i32
    return %arg0, %c0_i32 : i32, i32
  }
  func.func @transform_2(%arg0: i32) -> (i32, i32) {
    %c0_i32 = arith.constant 0 : i32
    %c0_i32_0 = arith.constant 0 : i32
    %c0_i32_1 = arith.constant 0 : i32
    return %c0_i32, %c0_i32_0 : i32, i32
  }
  func.func @transform_3(%arg0: i32) -> (i32, i32) {
    %c0_i32 = arith.constant 0 : i32
    %c0_i32_0 = arith.constant 0 : i32
    %c0_i32_1 = arith.constant 0 : i32
    return %c0_i32, %c0_i32_0 : i32, i32
  }
  func.func @transform_4(%arg0: i32) -> (i32, i32) {
    %c0_i32 = arith.constant 0 : i32
    %c0_i32_0 = arith.constant 0 : i32
    %c0_i32_1 = arith.constant 0 : i32
    return %c0_i32, %c0_i32_0 : i32, i32
  }
  func.func @transform_5(%arg0: i32) -> (i32, i32) {
    %c0_i32 = arith.constant 0 : i32
    %c0_i32_0 = arith.constant 0 : i32
    %c0_i32_1 = arith.constant 0 : i32
    return %c0_i32, %c0_i32_0 : i32, i32
  }
  func.func @transform_6(%arg0: i32) -> (i32, i32) {
    %c0_i32 = arith.constant 0 : i32
    %c0_i32_0 = arith.constant 0 : i32
    %c0_i32_1 = arith.constant 0 : i32
    return %c0_i32, %c0_i32_0 : i32, i32
  }
  func.func @transform_7(%arg0: i32) -> (i32, i32) {
    %c0_i32 = arith.constant 0 : i32
    %c0_i32_0 = arith.constant 0 : i32
    %c0_i32_1 = arith.constant 0 : i32
    return %c0_i32, %c0_i32_0 : i32, i32
  }
  func.func @transform_8(%arg0: i32) -> (i32, i32) {
    %c0_i32 = arith.constant 0 : i32
    %c0_i32_0 = arith.constant 0 : i32
    %c0_i32_1 = arith.constant 0 : i32
    return %c0_i32, %c0_i32_0 : i32, i32
  }
  func.func @transform_9(%arg0: i32) -> (i32, i32) {
    %c0_i32 = arith.constant 0 : i32
    %c0_i32_0 = arith.constant 0 : i32
    return %c0_i32, %arg0 : i32, i32
  }
}

</mosaic_0001>

<bundles_post_ra>
// kernel: tpu_custom_call.1
= control target key start
LH: loop header
LB: loop body
LE: loop exit
PB: predicated region body
PF: predicated region fallthrough
CT: control target
= control target key end

     0   :  { %vm42_vm0 = vcmask 261120   ;;  %vm143_vm1 = vcmask 130048   ;;  %v641_v2 = vmov 0   ;;  %vm516_vm10 = vcmask 31744   ;;  %s794_s1 = inlined_call_operand.vmem [shape: f32[4,32], index: 1, kind: input, shape index: {}]   ;;  %s795_s3 = inlined_call_operand.vmem [shape: f32[32,32], index: 3, kind: input, shape index: {}]   ;;  %s796_s0 = inlined_call_operand.vmem [shape: f32[4,16], index: 0, kind: input, shape index: {}]   ;;  %s797_s4 = inlined_call_operand.vmem [shape: f32[32,1], index: 4, kind: input, shape index: {}]   ;;  %s798_s2 = inlined_call_operand.vmem [shape: f32[32,16], index: 2, kind: input, shape index: {}]   ;;  %s799_s6 = inlined_call_operand.vmem [shape: f32[32,1], index: 6, kind: input, shape index: {}]   ;;  %s800_s8 = inlined_call_operand.vmem [shape: f32[16,1], index: 8, kind: input, shape index: {}]   ;;  %s801_s5 = inlined_call_operand.vmem [shape: f32[32,32], index: 5, kind: input, shape index: {}]   ;;  %s802_s7 = inlined_call_operand.vmem [shape: f32[16,32], index: 7, kind: input, shape index: {}]   ;;  %s803_s9 = inlined_call_operand.vmem [shape: f32[16,4], index: 9, kind: output, shape index: {}]  }
   0x1   :  { %v33_v0 = vld [vmem:[%s794_s1] sm:$0xf]  ;;  %635 = vset.pattern.permute.xlu0 %v641_v2  ;;  %636 = vset.pattern.permute.xlu1 %v641_v2  ;;  %v39_v4 = vld [vmem:[%s795_s3 + $0x8] sm:$0xff]  ;;  %v40_v5 = vld [vmem:[%s795_s3 + $0x10] sm:$0xff] }
   0x2   :  { %v38_v1 = vld [vmem:[%s795_s3] sm:$0xff]  ;;  %573 = vmatprep.subr.msk.mxu0 %vm42_vm0, %v33_v0  ;;  %v246_v7 = vld [vmem:[%s797_s4 + $0x10] sm:$0xff]  ;;  %v245_v8 = vld [vmem:[%s797_s4 + $0x8] sm:$0xff] }
   0x3   :  { %575 = vmatprep.mubr.msk.f32.mxu0 %vm42_vm0, %v38_v1  ;;  %v32_v3 = vld [vmem:[%s796_s0] sm:$0xf]  ;;  %574 = vmatpush3.xpose.msk.msra.mxu0 %vm42_vm0, %v33_v0  ;;  %v247_v9 = vld [vmem:[%s797_s4 + $0x18] sm:$0xff]  ;;  %v289_v13 = vld [vmem:[%s799_s6 + $0x8] sm:$0xff] }
   0x4   :  { %581 = vmatprep.subr.msk.mxu0 %vm143_vm1, %v32_v3  ;;  %v244_v6 = vld [vmem:[%s797_s4] sm:$0xff]  ;;  %260 = vperm.xlu1 %636, %v246_v7   ;;  %v41_v10 = vld [vmem:[%s795_s3 + $0x18] sm:$0xff]  ;;  %v35_v14 = vld [vmem:[%s798_s2 + $0x8] sm:$0xff] }
   0x5   :  { %250 = vperm.xlu0 %635, %v244_v6   ;;  %v34_v11 = vld [vmem:[%s798_s2] sm:$0xff]  ;;  %v36_v15 = vld [vmem:[%s798_s2 + $0x10] sm:$0xff]  ;;  %v291_v17 = vld [vmem:[%s799_s6 + $0x18] sm:$0xff] }
   0x6   :  { %576 = vmatmul.mubr.msk.f32.vlgmr.msra.gmra.mrb[0].mxu0 %vm42_vm0, %v39_v4  ;;  %v288_v12 = vld [vmem:[%s799_s6] sm:$0xff]  ;;  %v290_v16 = vld [vmem:[%s799_s6 + $0x10] sm:$0xff]  ;;  %v37_v18 = vld [vmem:[%s798_s2 + $0x18] sm:$0xff] }
   0x7   :  { %582 = vmatpush3.xpose.msk.msra.mxu0 %vm143_vm1, %v32_v3  ;;  %578 = vmatprep.mubr.msk.f32.mxu0 %vm42_vm0, %v40_v5  ;;  %v424_v19 = vld [vmem:[%s800_s8 + $0x8] sm:$0xff]  ;;  %v423_v20 = vld [vmem:[%s800_s8] sm:$0xff]  ;;  %v286_v45 = vld [vmem:[%s801_s5 + $0x10] sm:$0xff] }
   0x8   :  { %265 = vperm.xlu1 %636, %v247_v9   ;;  %v284_v21 = vld [vmem:[%s801_s5] sm:$0xff]  ;;  %v285_v44 = vld [vmem:[%s801_s5 + $0x8] sm:$0xff]  ;;  %v287_v46 = vld [vmem:[%s801_s5 + $0x18] sm:$0xff] }
   0x9   :  { %255 = vperm.xlu0 %635, %v245_v8   ;;  %597 = vmatprep.mubr.msk.f32.mxu1 %vm42_vm0, %v284_v21  ;;  %v421_v47 = vld [vmem:[%s802_s7] sm:$0xff]  ;;  %v422_v6 = vld [vmem:[%s802_s7 + $0x8] sm:$0xff] }
   0xa   :  { %579 = vmatmul.mubr.msk.f32.gmra.mrb[2].mxu0 %vm42_vm0, %v41_v10 }
   0xb   :  { %583 = vmatprep.mubr.msk.f32.mxu0 %vm143_vm1, %v34_v11 }
   0xc   :  { %299 = vperm.xlu1 %636, %v289_v13  }
   0xd   :  { %294 = vperm.xlu0 %635, %v288_v12  }
   0xe   :  { %584 = vmatmul.mubr.msk.f32.vlgmr.msra.gmra.mrb[0].mxu0 %vm143_vm1, %v35_v14 }
   0xf   :  { %586 = vmatprep.mubr.msk.f32.mxu0 %vm143_vm1, %v36_v15 }
  0x10   :  { %309 = vperm.xlu1 %636, %v291_v17  }
  0x11   :  { %304 = vperm.xlu0 %635, %v290_v16  }
  0x12   :  { %587 = vmatmul.mubr.msk.f32.gmra.mrb[2].mxu0 %vm143_vm1, %v37_v18 }
  0x14   :  { %427 = vperm.xlu1 %636, %v423_v20  }
  0x15   :  { %432 = vperm.xlu0 %635, %v424_v19  }
  0x83   :  { %v261_v23 = vpop.permute.xlu1 %260 }
  0x84   :  { %v251_v22 = vpop.permute.xlu0 %250 }
  0x87   :  { %v266_v30 = vpop.permute.xlu1 %265 }
  0x88   :  { %v256_v24 = vpop.permute.xlu0 %255 }
  0x8b   :  { %v300_v48 = vpop.permute.xlu1 %299 }
  0x8c   :  { %v295_v49 = vpop.permute.xlu0 %294 }
  0x8f   :  { %v310_v55 = vpop.permute.xlu1 %309 }
  0x90   :  { %v305_v58 = vpop.permute.xlu0 %304 }
  0x93   :  { %v428_v9 = vpop.permute.xlu1 %427 }
  0x94   :  { %v433_v7 = vpop.permute.xlu0 %432 }
  0xe1   :  { %v585_v25 = vpop.f32.mrb[0].mxu0 }
  0xe2   :  { %v269_v26 = vadd.f32 %v585_v25, %v256_v24  ;;  %v225_v27 = vpop.f32.mrb[1].mxu0 }
  0xe3   :  { %v268_v28 = vadd.f32 %v251_v22, %v225_v27 }
  0xe4   :  { %v277_v29 = vmul.f32 0.01, %v269_v26  ;;  %vm273_vm2 = vcmp.gt.f32.partialorder %v269_v26, 0.0 }
  0xe5   :  { %v276_v31 = vmul.f32 0.01, %v268_v28  ;;  %v588_v32 = vpop.f32.mrb[2].mxu0  ;;  %vm272_vm3 = vcmp.gt.f32.partialorder %v268_v28, 0.0 }
  0xe6   :  { %v271_v33 = vadd.f32 %v588_v32, %v266_v30  ;;  %v235_v34 = vpop.f32.mrb[3].mxu0  ;;  %v281_v35 = vsel %vm273_vm2, %v269_v26, %v277_v29 }
  0xe7   :  { %v270_v36 = vadd.f32 %v261_v23, %v235_v34  ;;  %v280_v37 = vsel %vm272_vm3, %v268_v28, %v276_v31 }
  0xe8   :  { %vm275_vm4 = vcmp.gt.f32.partialorder %v271_v33, 0.0  ;;  %v279_v38 = vmul.f32 0.01, %v271_v33  ;;  %v614_v39 = vpack.c.bf16 %v281_v35, %v280_v37 }
  0xe9   :  { %vm274_vm5 = vcmp.gt.f32.partialorder %v270_v36, 0.0  ;;  %v278_v40 = vmul.f32 0.01, %v270_v36 }
  0xea   :  { %615 = vmatprep.subr.bf16.mxu1 %v614_v39  ;;  %v283_v41 = vsel %vm275_vm4, %v271_v33, %v279_v38 }
  0xeb   :  { %617 = vmatpush3.bf16.msra.mxu1 %v614_v39  ;;  %v282_v42 = vsel %vm274_vm5, %v270_v36, %v278_v40 }
  0xec   :  { %v618_v43 = vpack.c.bf16 %v283_v41, %v282_v42 }
  0xee   :  { %619 = vmatprep.subr.bf16.mxu1 %v618_v43 }
  0xef   :  { %621 = vmatpush3.bf16.msra.mxu1 %v618_v43 }
  0xf2   :  { %598 = vmatmul.mubr.msk.f32.vlgmr.msra.gmra.mrb[0].mxu1 %vm42_vm0, %v285_v44 }
  0xf3   :  { %600 = vmatprep.mubr.msk.f32.mxu1 %vm42_vm0, %v286_v45 }
  0xf6   :  { %601 = vmatmul.mubr.msk.f32.gmra.mrb[2].mxu1 %vm42_vm0, %v287_v46 }
  0xf7   :  { %611 = vmatprep.mubr.msk.f32.mxu1 %vm42_vm0, %v421_v47 }
 0x1c5   :  { %v599_v50 = vpop.f32.mrb[0].mxu1 }
 0x1c6   :  { %v396_v51 = vadd.f32 %v599_v50, %v300_v48  ;;  %v390_v52 = vpop.f32.mrb[1].mxu1 }
 0x1c7   :  { %v391_v53 = vadd.f32 %v390_v52, %v295_v49 }
 0x1c8   :  { %vm410_vm6 = vcmp.gt.f32.partialorder %v396_v51, 0.0  ;;  %v414_v54 = vmul.f32 0.01, %v396_v51 }
 0x1c9   :  { %vm409_vm7 = vcmp.gt.f32.partialorder %v391_v53, 0.0  ;;  %v413_v56 = vmul.f32 0.01, %v391_v53  ;;  %v602_v57 = vpop.f32.mrb[2].mxu1 }
 0x1ca   :  { %v406_v59 = vadd.f32 %v602_v57, %v310_v55  ;;  %v400_v60 = vpop.f32.mrb[3].mxu1  ;;  %v418_v61 = vsel %vm410_vm6, %v396_v51, %v414_v54 }
 0x1cb   :  { %v401_v62 = vadd.f32 %v400_v60, %v305_v58  ;;  %v417_v63 = vsel %vm409_vm7, %v391_v53, %v413_v56 }
 0x1cc   :  { %vm412_vm8 = vcmp.gt.f32.partialorder %v406_v59, 0.0  ;;  %v416_v0 = vmul.f32 0.01, %v406_v59  ;;  %v622_v1 = vpack.c.bf16 %v418_v61, %v417_v63 }
 0x1cd   :  { %vm411_vm9 = vcmp.gt.f32.partialorder %v401_v62, 0.0  ;;  %v415_v2 = vmul.f32 0.01, %v401_v62 }
 0x1ce   :  { %623 = vmatprep.subr.bf16.mxu1 %v622_v1  ;;  %v420_v3 = vsel %vm412_vm8, %v406_v59, %v416_v0 }
 0x1cf   :  { %625 = vmatpush3.bf16.msra.mxu1 %v622_v1  ;;  %v419_v4 = vsel %vm411_vm9, %v401_v62, %v415_v2 }
 0x1d0   :  { %v626_v5 = vpack.c.bf16 %v420_v3, %v419_v4 }
 0x1d2   :  { %627 = vmatprep.subr.bf16.mxu1 %v626_v5 }
 0x1d3   :  { %629 = vmatpush3.bf16.msra.mxu1 %v626_v5 }
 0x1d6   :  { %612 = vmatmul.mubr.msk.f32.vlgmr.msra.gmra.mrb[4].mxu1 %vm42_vm0, %v422_v6 }
 0x2a9   :  { %v613_v8 = vpop.f32.mrb[4].mxu1 }
 0x2aa   :  { %v513_v10 = vadd.f32 %v613_v8, %v433_v7  ;;  %v507_v11 = vpop.f32.mrb[5].mxu1 }
 0x2ab   :  { %v508_v12 = vadd.f32 %v507_v11, %v428_v9 }
 0x2ac   :  { %v518_v13 = vmul.f32 1.442695, %v513_v10 }
 0x2ad   :  { %517 = vst.msk [vmem:[%s803_s9] sm:$0xff] %vm516_vm10, %v508_v12 }
 0x2ae   :  { %637 = vpow2.f32 %v518_v13 }
 0x2b8   :  { %v638_v14 = vpop.eup %637 }
 0x2b9   :  { %v520_v15 = vadd.f32 1e-06, %v638_v14 }
 0x2bb   :  { %639 = vrsqrt.f32 %v520_v15  ;;  %vm523_vm11 = vcmp.eq.f32.partialorder %v520_v15, inf  ;;  %v526_v18 = vand.u32 2147483648, %v520_v15  ;;  %vm525_vm12 = vcmp.eq.f32.partialorder %v520_v15, 0.0 }
 0x2c5   :  { %v640_v16 = vpop.eup %639 }
 0x2c6   :  { %v522_v17 = vmul.f32 %v640_v16, %v520_v15 }
 0x2c8   :  { %v524_v19 = vsel %vm523_vm11, %v520_v15, %v522_v17 }
 0x2c9   :  { %v527_v20 = vsel %vm525_vm12, %v526_v18, %v524_v19 }
 0x2ca   :  { %528 = vst.msk [vmem:[%s803_s9 + $0x8] sm:$0xff] %vm516_vm10, %v527_v20 }

</bundles_post_ra>
